<compile_context>
chip_gen: v7x
topology: tpu7x:2x2x1
jax: 0.10.0
libtpu: 0.0.40
codegen_flags: <defaults>
</compile_context>

<pallas_src>
import jax
import jax.numpy as jnp
from jax.experimental import pallas as pl
from jax.experimental.pallas import tpu as pltpu


BATCH_SIZE_OPTIONS = (32, 64, 128, 196)


# ------------------------------ Pallas kernel ------------------------------ #

def _select_batch_size_kernel(bs_ref, out_ref):
    """SMEM-only scalar kernel: out[0] = OPTIONS[argmax(bs_ref)].

    softmax elided (monotone), table baked as constants, argmax unrolled.
    """
    n = bs_ref.shape[0]

    # Statically-unrolled scalar argmax (first-max tie-breaking, like argmax).
    best_val = bs_ref[0]
    best_idx = jnp.int32(0)
    for i in range(1, n):  # n is static and tiny -> straight-line scalar code
        v = bs_ref[i]
        take = v > best_val
        best_val = jnp.where(take, v, best_val)
        best_idx = jnp.where(take, jnp.int32(i), best_idx)

    # Constant-table lookup via a short select chain (folds to an immediate
    # when best_idx is statically 0, i.e. the n == 1 case of the spec).
    selected = jnp.int32(BATCH_SIZE_OPTIONS[0])
    for i in range(1, len(BATCH_SIZE_OPTIONS)):
        selected = jnp.where(best_idx == jnp.int32(i),
                             jnp.int32(BATCH_SIZE_OPTIONS[i]), selected)

    out_ref[0] = selected


# -------------------------------- wrapper ---------------------------------- #

def hyperparameters_forward(params):
    """Returns [lr, weight_decay, momentum, selected_batch_size, dropout_rate]."""
    smem = pltpu.MemorySpace.SMEM

    bs = pl.pallas_call(
        _select_batch_size_kernel,
        out_shape=jax.ShapeDtypeStruct((1,), jnp.int32),
        in_specs=[pl.BlockSpec(memory_space=smem)],
        out_specs=pl.BlockSpec(memory_space=smem),
        cost_estimate=pl.CostEstimate(flops=8, transcendentals=0,
                                      bytes_accessed=8),
    )(params["batch_size"])

    # Pass-throughs returned directly (no kernel / DMA needed).
    # torch indexing tensor([...])[argmax] yields a 0-d scalar tensor;
    # torch uses int64 for the literal table, JAX default int32 is used here.
    return [params["lr"], params["weight_decay"], params["momentum"],
            bs[0], params["dropout_rate"]]


# ------------------------------ pure-JAX ref -------------------------------- #

def hyperparameters_reference(params):
    probs = jax.nn.softmax(params["batch_size"])
    idx = jnp.argmax(probs)
    opts = jnp.asarray(BATCH_SIZE_OPTIONS, jnp.int32)
    return [params["lr"], params["weight_decay"], params["momentum"],
            opts[idx], params["dropout_rate"]]


# ---------------------------------- main ------------------------------------ #

if __name__ == "__main__":
    key = jax.random.PRNGKey(0)
    ks = jax.random.split(key, 5)

    # Mirrors Hyperparameters.__init__: randn(1) scaled in-place.
    params = {
        "lr":           0.001  * jax.random.normal(ks[0], (1,), jnp.float32),
        "weight_decay": 0.0001 * jax.random.normal(ks[1], (1,), jnp.float32),
        "momentum":     0.1    * jax.random.normal(ks[2], (1,), jnp.float32),
        "batch_size":   0.1    * jax.random.normal(ks[3], (1,), jnp.float32),
        "dropout_rate": 0.1    * jax.random.normal(ks[4], (1,), jnp.float32),
    }

    outs = hyperparameters_forward(params)
    outs = jax.block_until_ready(outs)
    refs = hyperparameters_reference(params)

    # Pass-through float outputs must match exactly.
    for o, r in zip([outs[0], outs[1], outs[2], outs[4]],
                    [refs[0], refs[1], refs[2], refs[4]]):
        assert o.shape == (1,) and o.dtype == jnp.float32
        assert bool(jnp.all(o == r))

    # Selected batch size: argmax(softmax) over a length-1 vector -> index 0 -> 32.
    assert int(outs[3]) == int(refs[3]) == 32

    print("KERNEL_OK")
</pallas_src>

<mosaic_0001>
module attributes {stable_mosaic.version = 11 : i64} {
  func.func @_select_batch_size_kernel(%arg0: memref<1xf32, #tpu.memory_space<smem>>, %arg1: memref<1xi32, #tpu.memory_space<smem>>) attributes {dimension_semantics = [], scalar_prefetch = 0 : i64, scratch_operands = 0 : i64, tpu.core_type = #tpu.core_type<tc>} {
    %c0_i32 = arith.constant 0 : i32
    %c1_i32 = arith.constant 1 : i32
    %0 = arith.cmpi eq, %c0_i32, %c1_i32 : i32
    %c64_i32 = arith.constant 64 : i32
    %c32_i32 = arith.constant 32 : i32
    %1 = arith.select %0, %c64_i32, %c32_i32 : i32
    %c0_i32_0 = arith.constant 0 : i32
    %c2_i32 = arith.constant 2 : i32
    %2 = arith.cmpi eq, %c0_i32_0, %c2_i32 : i32
    %c128_i32 = arith.constant 128 : i32
    %3 = arith.select %2, %c128_i32, %1 : i32
    %c0_i32_1 = arith.constant 0 : i32
    %c3_i32 = arith.constant 3 : i32
    %4 = arith.cmpi eq, %c0_i32_1, %c3_i32 : i32
    %c196_i32 = arith.constant 196 : i32
    %5 = arith.select %4, %c196_i32, %3 : i32
    %c0 = arith.constant 0 : index
    %6 = memref.load %arg1[%c0] : memref<1xi32, #tpu.memory_space<smem>>
    memref.store %5, %arg1[%c0] : memref<1xi32, #tpu.memory_space<smem>>
    return
  }
}

</mosaic_0001>

<bundles_post_ra>
// kernel: tpu_custom_call.1
= control target key start
LH: loop header
LB: loop body
LE: loop exit
PB: predicated region body
PF: predicated region fallthrough
CT: control target
= control target key end

     0   :  { %7 = vsyncpa [#allocation4], 0  ;;  %s39_s6 = smov 32   ;;  %s63_s0 = inlined_call_operand.<no memory space> [shape: f32[1], index: 0, kind: input, shape index: {}]   ;;  %s64_s1 = inlined_call_operand.hbm [shape: s32[1], index: 1, kind: output, shape index: {}]  }
   0x1   :  { %11 = sst [smem:[#allocation3]] %s39_s6  ;;  %s27_s9 = scalar_lea.hbm %s64_s1, 16 }
   0x2   :  { %p28_p0 = scmp.ne.s32.totalorder %s64_s1, %s27_s9  ;;  %p31_p1 = scmp.lt.u32.totalorder %s27_s9, %s64_s1 }
   0x4   :  { %p33_p2 = pnand %p31_p1, %p28_p0 }
   0x6   :  { %36 = shalt.err (!%p33_p2)
}
   0x7   :  { %s40_s0 = smov [#allocation3]  }
   0x8   :  { %19 = dma.smem_to_hbm %s40_s0, 16, %s64_s1, [#allocation4]  }
   0x9   :  { %37 = dma.done.wait [#allocation4], 16  }
   0xa   :  { %38 = vsyncadd [#allocation4], 4294967280 }
   0xb   :  { %23 = sfence }
   0xc   :  { %24 = vsyncpa [#allocation4], 1 }

</bundles_post_ra>
